<compile_context>
chip_gen: v6e
topology: v6e:2x2x1
jax: 0.10.0
libtpu: 0.0.40
codegen_flags: <defaults>
</compile_context>

<pallas_src>
import functools

import jax
import jax.numpy as jnp
from jax import lax
from jax.experimental import pallas as pl
from jax.experimental.pallas import tpu as pltpu


def _cdiv(a, b):
    return (a + b - 1) // b


def _pearson_loss_kernel(*refs, nt, inv_t, true_t, block_t, t_tail, use_mxu):
    """Grid = (batch_blocks, t_blocks); axis 1 (T) is the reduction axis."""
    if use_mxu:
        yp_ref, yt_ref, ones_ref, loss_ref, sx, sy, sxx, syy, sxy = refs
    else:
        yp_ref, yt_ref, loss_ref, sx, sy, sxx, syy, sxy = refs
        ones_ref = None

    j = pl.program_id(1)

    @pl.when(j == 0)
    def _init():
        for r in (sx, sy, sxx, syy, sxy):
            r[...] = jnp.zeros_like(r)

    # Native-dtype tiles (bf16 stays bf16 in HBM/VMEM; cast below mirrors
    # torch's .float()).
    xn_full = yp_ref[...]
    yn_full = yt_ref[...]

    def accumulate(xn, yn):
        x = xn.astype(jnp.float32)
        y = yn.astype(jnp.float32)
        if use_mxu:
            # Row sums on the idle MXU: every result column equals the row
            # sum; f32 accumulation of value*1 products is exact.
            ones = ones_ref[...]
            sx[...] += jnp.dot(xn, ones,
                               preferred_element_type=jnp.float32)[:, :1]
            sy[...] += jnp.dot(yn, ones,
                               preferred_element_type=jnp.float32)[:, :1]
        else:
            sx[...] += jnp.sum(x, axis=1, keepdims=True)
            sy[...] += jnp.sum(y, axis=1, keepdims=True)
        sxx[...] += jnp.sum(x * x, axis=1, keepdims=True)
        syy[...] += jnp.sum(y * y, axis=1, keepdims=True)
        sxy[...] += jnp.sum(x * y, axis=1, keepdims=True)

    if t_tail:
        # T not a multiple of block_t: only the last T block carries undefined
        # out-of-bounds lanes, so only that block pays the masking cost.
        rem = true_t - (nt - 1) * block_t  # static Python int

        @pl.when(j < nt - 1)
        def _full_blocks():
            accumulate(xn_full, yn_full)

        @pl.when(j == nt - 1)
        def _tail_block():
            lane = lax.broadcasted_iota(jnp.int32, xn_full.shape, 1)
            keep = lane < rem
            zx = jnp.zeros((), xn_full.dtype)
            zy = jnp.zeros((), yn_full.dtype)
            # Mask BEFORE the products (0*Inf would poison the sums).
            accumulate(jnp.where(keep, xn_full, zx),
                       jnp.where(keep, yn_full, zy))
    else:
        accumulate(xn_full, yn_full)

    @pl.when(j == nt - 1)
    def _finalize():
        sxv = sx[...]
        syv = sy[...]
        cov = sxy[...] - sxv * syv * inv_t
        var_p = sxx[...] - sxv * sxv * inv_t
        var_t = syy[...] - syv * syv * inv_t
        # rsqrt runs on the EUP; no eps, matching the torch module.  Rows from
        # a partial batch block may produce NaN here but their output rows are
        # out-of-bounds and dropped on writeback.
        loss_ref[...] = 1.0 - cov * lax.rsqrt(var_p * var_t)


def pearson_loss(y_pred, y_true, *, block_b=None, block_t=None,
                 use_mxu_row_sums=None):
    """Pallas implementation of PearsonLoss.forward.

    Args:
      y_pred, y_true: (B, T) arrays; computed in float32 (like `.float()`),
        but 16-bit inputs stay 16-bit in HBM (cast happens in-kernel).
      block_b, block_t: optional tile overrides (block_b multiple of 8 or ==B;
        block_t multiple of 128 or ==T).
      use_mxu_row_sums: force/disable the MXU row-sum path (default: on for
        16-bit inputs).
    Returns:
      scalar float32 loss = mean_over_batch(1 - pearson_corr_per_row).
    """
    assert y_pred.shape == y_true.shape and y_pred.ndim == 2
    if y_pred.dtype != y_true.dtype:
        dt = jnp.promote_types(y_pred.dtype, y_true.dtype)
        y_pred, y_true = y_pred.astype(dt), y_true.astype(dt)
    if (not jnp.issubdtype(y_pred.dtype, jnp.floating)
            or jnp.dtype(y_pred.dtype).itemsize > 4):
        y_pred = y_pred.astype(jnp.float32)
        y_true = y_true.astype(jnp.float32)

    B, T = y_pred.shape
    itemsize = jnp.dtype(y_pred.dtype).itemsize
    sub = {4: 8, 2: 16, 1: 32}.get(itemsize, 8)

    # ---- Batch tile: keep >= 2 batch blocks whenever B > 8 so the "parallel"
    # axis shards across v7x's two TensorCores; prefer the packed sublane
    # multiple (16 for 16-bit dtypes) when it still allows the split.
    if block_b is None:
        if B <= 8:
            block_b = B                                  # full-dim block
        else:
            half = _cdiv(B, 2)
            m = sub if half >= sub else 8
            block_b = min(max(8, (half // m) * m), 256)
    assert block_b == B or block_b % 8 == 0, "block_b must be mult of 8 or B"

    # ---- T tile: byte-targeted (~1 MiB per input block) so per-grid-step
    # overhead (~0.35 us) is amortised and the pipeline stays HBM-bound.
    if block_t is None:
        target = 1 << 20
        row_bytes = block_b * itemsize
        if T <= 256 or T * row_bytes <= 2 * target:
            block_t = T                                   # single T step
        else:
            want = max(512, target // row_bytes)
            block_t = min(max(128, (want // 128) * 128), 8192)
    assert block_t == T or block_t % 128 == 0, "block_t must be mult of 128 or T"

    nb = _cdiv(B, block_b)
    nt = _cdiv(T, block_t)
    t_tail = (T % block_t) != 0
    inv_t = 1.0 / float(T)

    if use_mxu_row_sums is None:
        use_mxu_row_sums = itemsize <= 2   # bf16/fp16: VALU is co-binding

    kernel = functools.partial(
        _pearson_loss_kernel, nt=nt, inv_t=inv_t, true_t=T, block_t=block_t,
        t_tail=t_tail, use_mxu=use_mxu_row_sums)

    in_specs = [
        pl.BlockSpec((block_b, block_t), lambda i, j: (i, j)),
        pl.BlockSpec((block_b, block_t), lambda i, j: (i, j)),
    ]
    args = [y_pred, y_true]
    if use_mxu_row_sums:
        # Constant index_map -> fetched once, stays resident in VMEM.
        ones = jnp.ones((block_t, 128), dtype=y_pred.dtype)
        in_specs.append(pl.BlockSpec((block_t, 128), lambda i, j: (0, 0)))
        args.append(ones)

    # VMEM budget: 2 inputs x 2 pipeline buffers (+ resident ones) + slack.
    block_bytes = block_b * block_t * itemsize
    ones_bytes = block_t * 128 * itemsize if use_mxu_row_sums else 0
    need = 4 * block_bytes + 2 * ones_bytes + (2 << 20)
    vmem_limit = int(min(max(need, 16 << 20), 48 << 20))

    per_row_loss = pl.pallas_call(
        kernel,
        out_shape=jax.ShapeDtypeStruct((B, 1), jnp.float32),
        grid_spec=pltpu.PrefetchScalarGridSpec(
            num_scalar_prefetch=0,
            grid=(nb, nt),
            in_specs=in_specs,
            # Output block resident across the T (reduction) axis; written
            # once per batch block at the last T step.
            out_specs=pl.BlockSpec((block_b, 1), lambda i, j: (i, 0)),
            scratch_shapes=[pltpu.VMEM((block_b, 1), jnp.float32)
                            for _ in range(5)],
        ),
        compiler_params=pltpu.CompilerParams(
            dimension_semantics=("parallel", "arbitrary"),
            vmem_limit_bytes=vmem_limit),
    )(*args)

    # Tiny mean over the batch in XLA (keeps the batch grid axis parallel).
    return jnp.mean(per_row_loss[:, 0])


def _pearson_loss_ref(y_pred, y_true):
    """Pure-JAX reference mirroring the torch module (two-pass centered)."""
    yp = y_pred.astype(jnp.float32)
    yt = y_true.astype(jnp.float32)
    yp_c = yp - jnp.mean(yp, axis=1, keepdims=True)
    yt_c = yt - jnp.mean(yt, axis=1, keepdims=True)
    cov = jnp.sum(yp_c * yt_c, axis=1)
    std_p = jnp.sqrt(jnp.sum(yp_c ** 2, axis=1))
    std_t = jnp.sqrt(jnp.sum(yt_c ** 2, axis=1))
    return jnp.mean(1.0 - cov / (std_p * std_t))


if __name__ == "__main__":
    key = jax.random.PRNGKey(0)
    ks = jax.random.split(key, 8)

    # Case 1: f32, default tile selection (full-T block, batch split into two
    # blocks for the parallel/megacore axis).  No padding anywhere.
    B, T = 16, 1536
    yp = jax.random.normal(ks[0], (B, T), dtype=jnp.float32)
    yt = jax.random.normal(ks[1], (B, T), dtype=jnp.float32)
    out = pearson_loss(yp, yt)
    jax.block_until_ready(out)
    ref = _pearson_loss_ref(yp, yt)
    assert jnp.allclose(out, ref, atol=1e-4, rtol=1e-4), (out, ref)

    # Case 2: f32 with forced small tiles -> multi-step T accumulation, T-tail
    # masking (600 = 2*256 + 88) and a partial batch block (10 = 8 + 2).
    B, T = 10, 600
    yp = jax.random.normal(ks[2], (B, T), dtype=jnp.float32)
    yt = jax.random.normal(ks[3], (B, T), dtype=jnp.float32)
    out = pearson_loss(yp, yt, block_b=8, block_t=256)
    jax.block_until_ready(out)
    ref = _pearson_loss_ref(yp, yt)
    assert jnp.allclose(out, ref, atol=1e-4, rtol=1e-4), (out, ref)

    # Case 3: bf16, odd shapes, defaults -> full-dim blocks + MXU row sums.
    B, T = 6, 200
    yp = jax.random.normal(ks[4], (B, T), dtype=jnp.bfloat16)
    yt = jax.random.normal(ks[5], (B, T), dtype=jnp.bfloat16)
    out = pearson_loss(yp, yt)
    jax.block_until_ready(out)
    ref = _pearson_loss_ref(yp, yt)
    assert jnp.allclose(out, ref, atol=1e-3, rtol=1e-3), (out, ref)

    # Case 4: bf16 with forced tiles -> MXU row sums + T-tail masking +
    # partial batch block, all combined (520 = 2*256 + 8; 12 = 8 + 4).
    B, T = 12, 520
    yp = jax.random.normal(ks[6], (B, T), dtype=jnp.bfloat16)
    yt = jax.random.normal(ks[7], (B, T), dtype=jnp.bfloat16)
    out = pearson_loss(yp, yt, block_b=8, block_t=256)
    jax.block_until_ready(out)
    ref = _pearson_loss_ref(yp, yt)
    assert jnp.allclose(out, ref, atol=1e-3, rtol=1e-3), (out, ref)

    print("KERNEL_OK")
</pallas_src>

<mosaic_0001>
module attributes {stable_mosaic.version = 11 : i64} {
  func.func @_pearson_loss_kernel(%arg0: i32, %arg1: i32, %arg2: memref<8x1536xf32, #tpu.memory_space<vmem>>, %arg3: memref<8x1536xf32, #tpu.memory_space<vmem>>, %arg4: memref<8x1xf32, #tpu.memory_space<vmem>>, %arg5: memref<8x1xf32, #tpu.memory_space<vmem>>, %arg6: memref<8x1xf32, #tpu.memory_space<vmem>>, %arg7: memref<8x1xf32, #tpu.memory_space<vmem>>, %arg8: memref<8x1xf32, #tpu.memory_space<vmem>>, %arg9: memref<8x1xf32, #tpu.memory_space<vmem>>) attributes {dimension_semantics = [#tpu.dimension_semantics<parallel>, #tpu.dimension_semantics<arbitrary>], iteration_bounds = array<i64: 2, 1>, scalar_prefetch = 0 : i64, scratch_operands = 5 : i64, tpu.core_type = #tpu.core_type<tc>, window_params = [{transform_indices = @transform_0, window_bounds = array<i64: 8, 1536>}, {transform_indices = @transform_1, window_bounds = array<i64: 8, 1536>}, {transform_indices = @transform_2, window_bounds = array<i64: 8, 1>}]} {
    %c0_i32 = arith.constant 0 : i32
    %0 = arith.cmpi eq, %arg1, %c0_i32 : i32
    %1 = arith.extui %0 : i1 to i32
    %c0_i32_0 = arith.constant 0 : i32
    %2 = arith.cmpi ne, %1, %c0_i32_0 : i32
    scf.if %2 {
      %cst_30 = arith.constant 0.000000e+00 : f32
      %36 = vector.broadcast %cst_30 : f32 to vector<8x1xf32>
      %c0_31 = arith.constant 0 : index
      %c0_32 = arith.constant 0 : index
      %37 = vector.load %arg5[%c0_31, %c0_32] : memref<8x1xf32, #tpu.memory_space<vmem>>, vector<8x1xf32>
      tpu.vector_store %arg5[%c0_31, %c0_32], %36 {strides = array<i32>} : memref<8x1xf32, #tpu.memory_space<vmem>>, vector<8x1xf32>,
      %cst_33 = arith.constant 0.000000e+00 : f32
      %38 = vector.broadcast %cst_33 : f32 to vector<8x1xf32>
      %c0_34 = arith.constant 0 : index
      %c0_35 = arith.constant 0 : index
      %39 = vector.load %arg6[%c0_34, %c0_35] : memref<8x1xf32, #tpu.memory_space<vmem>>, vector<8x1xf32>
      tpu.vector_store %arg6[%c0_34, %c0_35], %38 {strides = array<i32>} : memref<8x1xf32, #tpu.memory_space<vmem>>, vector<8x1xf32>,
      %cst_36 = arith.constant 0.000000e+00 : f32
      %40 = vector.broadcast %cst_36 : f32 to vector<8x1xf32>
      %c0_37 = arith.constant 0 : index
      %c0_38 = arith.constant 0 : index
      %41 = vector.load %arg7[%c0_37, %c0_38] : memref<8x1xf32, #tpu.memory_space<vmem>>, vector<8x1xf32>
      tpu.vector_store %arg7[%c0_37, %c0_38], %40 {strides = array<i32>} : memref<8x1xf32, #tpu.memory_space<vmem>>, vector<8x1xf32>,
      %cst_39 = arith.constant 0.000000e+00 : f32
      %42 = vector.broadcast %cst_39 : f32 to vector<8x1xf32>
      %c0_40 = arith.constant 0 : index
      %c0_41 = arith.constant 0 : index
      %43 = vector.load %arg8[%c0_40, %c0_41] : memref<8x1xf32, #tpu.memory_space<vmem>>, vector<8x1xf32>
      tpu.vector_store %arg8[%c0_40, %c0_41], %42 {strides = array<i32>} : memref<8x1xf32, #tpu.memory_space<vmem>>, vector<8x1xf32>,
      %cst_42 = arith.constant 0.000000e+00 : f32
      %44 = vector.broadcast %cst_42 : f32 to vector<8x1xf32>
      %c0_43 = arith.constant 0 : index
      %c0_44 = arith.constant 0 : index
      %45 = vector.load %arg9[%c0_43, %c0_44] : memref<8x1xf32, #tpu.memory_space<vmem>>, vector<8x1xf32>
      tpu.vector_store %arg9[%c0_43, %c0_44], %44 {strides = array<i32>} : memref<8x1xf32, #tpu.memory_space<vmem>>, vector<8x1xf32>,
    } else {
    }
    %c0 = arith.constant 0 : index
    %c0_1 = arith.constant 0 : index
    %3 = vector.load %arg2[%c0, %c0_1] : memref<8x1536xf32, #tpu.memory_space<vmem>>, vector<8x1536xf32>
    %c0_2 = arith.constant 0 : index
    %c0_3 = arith.constant 0 : index
    %4 = vector.load %arg3[%c0_2, %c0_3] : memref<8x1536xf32, #tpu.memory_space<vmem>>, vector<8x1536xf32>
    %c0_4 = arith.constant 0 : index
    %c0_5 = arith.constant 0 : index
    %5 = vector.load %arg5[%c0_4, %c0_5] : memref<8x1xf32, #tpu.memory_space<vmem>>, vector<8x1xf32>
    %cst = arith.constant dense<0.000000e+00> : vector<8xf32>
    %6 = vector.multi_reduction <add>, %3, %cst [1] : vector<8x1536xf32> to vector<8xf32>
    %7 = vector.shape_cast %6 : vector<8xf32> to vector<8x1xf32>
    %8 = arith.addf %5, %7 : vector<8x1xf32>
    %c0_6 = arith.constant 0 : index
    %c0_7 = arith.constant 0 : index
    %9 = vector.load %arg5[%c0_6, %c0_7] : memref<8x1xf32, #tpu.memory_space<vmem>>, vector<8x1xf32>
    tpu.vector_store %arg5[%c0_6, %c0_7], %8 {strides = array<i32>} : memref<8x1xf32, #tpu.memory_space<vmem>>, vector<8x1xf32>,
    %c0_8 = arith.constant 0 : index
    %c0_9 = arith.constant 0 : index
    %10 = vector.load %arg6[%c0_8, %c0_9] : memref<8x1xf32, #tpu.memory_space<vmem>>, vector<8x1xf32>
    %cst_10 = arith.constant dense<0.000000e+00> : vector<8xf32>
    %11 = vector.multi_reduction <add>, %4, %cst_10 [1] : vector<8x1536xf32> to vector<8xf32>
    %12 = vector.shape_cast %11 : vector<8xf32> to vector<8x1xf32>
    %13 = arith.addf %10, %12 : vector<8x1xf32>
    %c0_11 = arith.constant 0 : index
    %c0_12 = arith.constant 0 : index
    %14 = vector.load %arg6[%c0_11, %c0_12] : memref<8x1xf32, #tpu.memory_space<vmem>>, vector<8x1xf32>
    tpu.vector_store %arg6[%c0_11, %c0_12], %13 {strides = array<i32>} : memref<8x1xf32, #tpu.memory_space<vmem>>, vector<8x1xf32>,
    %c0_13 = arith.constant 0 : index
    %c0_14 = arith.constant 0 : index
    %15 = vector.load %arg7[%c0_13, %c0_14] : memref<8x1xf32, #tpu.memory_space<vmem>>, vector<8x1xf32>
    %16 = arith.mulf %3, %3 : vector<8x1536xf32>
    %cst_15 = arith.constant dense<0.000000e+00> : vector<8xf32>
    %17 = vector.multi_reduction <add>, %16, %cst_15 [1] : vector<8x1536xf32> to vector<8xf32>
    %18 = vector.shape_cast %17 : vector<8xf32> to vector<8x1xf32>
    %19 = arith.addf %15, %18 : vector<8x1xf32>
    %c0_16 = arith.constant 0 : index
    %c0_17 = arith.constant 0 : index
    %20 = vector.load %arg7[%c0_16, %c0_17] : memref<8x1xf32, #tpu.memory_space<vmem>>, vector<8x1xf32>
    tpu.vector_store %arg7[%c0_16, %c0_17], %19 {strides = array<i32>} : memref<8x1xf32, #tpu.memory_space<vmem>>, vector<8x1xf32>,
    %c0_18 = arith.constant 0 : index
    %c0_19 = arith.constant 0 : index
    %21 = vector.load %arg8[%c0_18, %c0_19] : memref<8x1xf32, #tpu.memory_space<vmem>>, vector<8x1xf32>
    %22 = arith.mulf %4, %4 : vector<8x1536xf32>
    %cst_20 = arith.constant dense<0.000000e+00> : vector<8xf32>
    %23 = vector.multi_reduction <add>, %22, %cst_20 [1] : vector<8x1536xf32> to vector<8xf32>
    %24 = vector.shape_cast %23 : vector<8xf32> to vector<8x1xf32>
    %25 = arith.addf %21, %24 : vector<8x1xf32>
    %c0_21 = arith.constant 0 : index
    %c0_22 = arith.constant 0 : index
    %26 = vector.load %arg8[%c0_21, %c0_22] : memref<8x1xf32, #tpu.memory_space<vmem>>, vector<8x1xf32>
    tpu.vector_store %arg8[%c0_21, %c0_22], %25 {strides = array<i32>} : memref<8x1xf32, #tpu.memory_space<vmem>>, vector<8x1xf32>,
    %c0_23 = arith.constant 0 : index
    %c0_24 = arith.constant 0 : index
    %27 = vector.load %arg9[%c0_23, %c0_24] : memref<8x1xf32, #tpu.memory_space<vmem>>, vector<8x1xf32>
    %28 = arith.mulf %3, %4 : vector<8x1536xf32>
    %cst_25 = arith.constant dense<0.000000e+00> : vector<8xf32>
    %29 = vector.multi_reduction <add>, %28, %cst_25 [1] : vector<8x1536xf32> to vector<8xf32>
    %30 = vector.shape_cast %29 : vector<8xf32> to vector<8x1xf32>
    %31 = arith.addf %27, %30 : vector<8x1xf32>
    %c0_26 = arith.constant 0 : index
    %c0_27 = arith.constant 0 : index
    %32 = vector.load %arg9[%c0_26, %c0_27] : memref<8x1xf32, #tpu.memory_space<vmem>>, vector<8x1xf32>
    tpu.vector_store %arg9[%c0_26, %c0_27], %31 {strides = array<i32>} : memref<8x1xf32, #tpu.memory_space<vmem>>, vector<8x1xf32>,
    %c0_i32_28 = arith.constant 0 : i32
    %33 = arith.cmpi eq, %arg1, %c0_i32_28 : i32
    %34 = arith.extui %33 : i1 to i32
    %c0_i32_29 = arith.constant 0 : i32
    %35 = arith.cmpi ne, %34, %c0_i32_29 : i32
    scf.if %35 {
      %c0_30 = arith.constant 0 : index
      %c0_31 = arith.constant 0 : index
      %36 = vector.load %arg5[%c0_30, %c0_31] : memref<8x1xf32, #tpu.memory_space<vmem>>, vector<8x1xf32>
      %c0_32 = arith.constant 0 : index
      %c0_33 = arith.constant 0 : index
      %37 = vector.load %arg6[%c0_32, %c0_33] : memref<8x1xf32, #tpu.memory_space<vmem>>, vector<8x1xf32>
      %c0_34 = arith.constant 0 : index
      %c0_35 = arith.constant 0 : index
      %38 = vector.load %arg9[%c0_34, %c0_35] : memref<8x1xf32, #tpu.memory_space<vmem>>, vector<8x1xf32>
      %39 = arith.mulf %36, %37 : vector<8x1xf32>
      %cst_36 = arith.constant 6.51041686E-4 : f32
      %40 = vector.broadcast %cst_36 : f32 to vector<8x1xf32>
      %41 = arith.mulf %39, %40 : vector<8x1xf32>
      %42 = arith.subf %38, %41 : vector<8x1xf32>
      %c0_37 = arith.constant 0 : index
      %c0_38 = arith.constant 0 : index
      %43 = vector.load %arg7[%c0_37, %c0_38] : memref<8x1xf32, #tpu.memory_space<vmem>>, vector<8x1xf32>
      %44 = arith.mulf %36, %36 : vector<8x1xf32>
      %cst_39 = arith.constant 6.51041686E-4 : f32
      %45 = vector.broadcast %cst_39 : f32 to vector<8x1xf32>
      %46 = arith.mulf %44, %45 : vector<8x1xf32>
      %47 = arith.subf %43, %46 : vector<8x1xf32>
      %c0_40 = arith.constant 0 : index
      %c0_41 = arith.constant 0 : index
      %48 = vector.load %arg8[%c0_40, %c0_41] : memref<8x1xf32, #tpu.memory_space<vmem>>, vector<8x1xf32>
      %49 = arith.mulf %37, %37 : vector<8x1xf32>
      %cst_42 = arith.constant 6.51041686E-4 : f32
      %50 = vector.broadcast %cst_42 : f32 to vector<8x1xf32>
      %51 = arith.mulf %49, %50 : vector<8x1xf32>
      %52 = arith.subf %48, %51 : vector<8x1xf32>
      %53 = arith.mulf %47, %52 : vector<8x1xf32>
      %54 = math.rsqrt %53 : vector<8x1xf32>
      %55 = arith.mulf %42, %54 : vector<8x1xf32>
      %cst_43 = arith.constant 1.000000e+00 : f32
      %56 = vector.broadcast %cst_43 : f32 to vector<8x1xf32>
      %57 = arith.subf %56, %55 : vector<8x1xf32>
      %c0_44 = arith.constant 0 : index
      %c0_45 = arith.constant 0 : index
      %58 = vector.load %arg4[%c0_44, %c0_45] : memref<8x1xf32, #tpu.memory_space<vmem>>, vector<8x1xf32>
      tpu.vector_store %arg4[%c0_44, %c0_45], %57 {strides = array<i32>} : memref<8x1xf32, #tpu.memory_space<vmem>>, vector<8x1xf32>,
    } else {
    }
    return
  }
  func.func @transform_0(%arg0: i32, %arg1: i32) -> (i32, i32) {
    %c0_i32 = arith.constant 0 : i32
    return %arg0, %arg1 : i32, i32
  }
  func.func @transform_1(%arg0: i32, %arg1: i32) -> (i32, i32) {
    %c0_i32 = arith.constant 0 : i32
    return %arg0, %arg1 : i32, i32
  }
  func.func @transform_2(%arg0: i32, %arg1: i32) -> (i32, i32) {
    %c0_i32 = arith.constant 0 : i32
    %c0_i32_0 = arith.constant 0 : i32
    return %arg0, %c0_i32 : i32, i32
  }
}

</mosaic_0001>

<bundles_post_ra>
// kernel: tpu_custom_call.1
= control target key start
LH: loop header
LB: loop body
LE: loop exit
PB: predicated region body
PF: predicated region fallthrough
CT: control target
= control target key end

     0   :  { %7 = vsyncpa [#allocation8], 0  ;;  %s892_s0 = inlined_call_operand.hbm [shape: f32[16,1536], index: 0, kind: input, shape index: {}]   ;;  %s893_s1 = inlined_call_operand.hbm [shape: f32[16,1536], index: 1, kind: input, shape index: {}]   ;;  %s894_s2 = inlined_call_operand.vmem [shape: f32[16,1], index: 2, kind: output, shape index: {}]  }
   0x1   :  { %9 = vsyncpa [#allocation8 + $0x1], 0 }
   0x2   :  { %10 = vsyncpa [#allocation10], 0 }
   0x3   :  { %12 = vsyncpa [#allocation10 + $0x1], 0  ;;  %s703_s9 = smov 0   ;;  %s705_s10 = smov 0  }
   0x4   :  { %s707_s11 = smov 0   ;;  %s709_s12 = smov 0  }
   0x5   :  { %s711_s13 = smov 0   ;;  %s713_s14 = smov 0  }
   0x6 LB: > { %s495_s15 = sadd.s32 4294967295, %s683_s14   ;;  %s30_s16 = sadd.s32 1, %s679_s13  ;;  %s683_s14 = sphi %s713_s14, %s18_s14   ;;  %s679_s13 = sphi %s711_s13, %s902_s13   ;;  %s675_s12 = sphi %s709_s12, %s901_s12   ;;  %s671_s11 = sphi %s707_s11, %s900_s11   ;;  %s667_s10 = sphi %s705_s10, %s899_s10   ;;  %s663_s9 = sphi %s703_s9, %s898_s9  }
   0x7   : > { %p32_p0 = scmp.ge.s32.totalorder %s30_s16, 2  ;;  %s39_s17 = sadd.s32 1, %s671_s11 }
   0x8   : > { %p46_p1 = scmp.ne.s32.totalorder %s671_s11, %s667_s10  ;;  %p47_p2 = scmp.eq.s32.totalorder %s683_s14, 0 }
   0x9   : > { %s904_s16 = smov (%p32_p0, %s30_s16), 0  ;;  %p52_p4 = scmp.ne.s32.totalorder %s667_s10, %s663_s9 }
   0xa   : > { %p48_p3 = por %p47_p2, %p46_p1  ;;  %s34_s18 = ssub.s32 %s679_s13, %s904_s16 }
   0xb   : > { %p53_p5 = scmp.eq.s32.totalorder %s495_s15, 0  ;;  %p37_p6 = scmp.eq.s32.totalorder %s34_s18, 0 }
   0xc   : > { %p521_p8 = scmp.lt.s32.totalorder %s683_s14, 2  ;;  %s751_s21 = sand.u32 1, %s671_s11  }
   0xd   : > { %p742_p7 = por %p53_p5, %p52_p4  ;;  %s506_s22 = smul.u32 1536, %s679_s13 }
   0xe   : > { %s748_s20 = scalar_select %p37_p6, %s671_s11, %s39_s17  }
   0xf   : > { %s505_s23 = smul.u32 96, %s751_s21  ;;  %s142_s26 = scalar_lea.hbm %s892_s0, %s506_s22 }
  0x10   : > { %p758_p9 = pnand %p521_p8, %p48_p3  ;;  %p501_p10 = scmp.ge.s32.totalorder %s683_s14, 1 }
  0x11   : > { %s134_s28 = scalar_lea.vmem [#allocation7], %s505_s23  ;;  %p170_p11 = scmp.lt.s32.totalorder %s683_s14, 3 }
  0x12   : > { %s144_s29 = sshll.u32 %s134_s28, 4  ;;  %s131_s30 = scalar_lea.sflag [#allocation8], %s751_s21  ;;  %s145_s29 = int_to_ptr.vmem [resolvable:$true] %s144_s29 }
  0x13   : > { %p575_p12 = pneg %p758_p9  ;;  %s586_s3 = scalar_lea.vmem %s145_s29, 1536 }
  0x14   : > { %p587_p13 = scmp.ne.s32.totalorder %s145_s29, %s586_s3  ;;  %s685_s4 = smov [#allocation7]  }
  0x15   : > { %s591_s5 = sshll.u32 %s685_s4, 4  ;;  %s592_s5 = int_to_ptr.vmem [resolvable:$false] %s591_s5 }
  0x16   : > { %p589_p0 = pnand %p587_p13, %p575_p12  ;;  %s593_s6 = scalar_lea.vmem %s592_s5, 3072 }
  0x17   : > { %p594_p2 = scmp.lt.s32.totalorder %s145_s29, %s592_s5  ;;  %p595_p3 = scmp.lt.s32.totalorder %s593_s6, %s586_s3 }
  0x18   : > { %p590_p1 = pneg %p589_p0 }
  0x19   : > { %p596_p4 = por %p595_p3, %p594_p2 }
  0x1b   : > { %p597_p5 = pnand %p596_p4, %p590_p1 }
  0x1d   : > { %600 = shalt.err (!%p597_p5)
}
  0x1e   : > { %517 = dma.hbm_to_vmem [thread:$0]  (!%p758_p9), %s142_s26, 1536, %s145_s29, %s131_s30  }
  0x1f   : > { %p776_p6 = pnand %p501_p10, %p170_p11  ;;  %s163_s15 = scalar_lea.hbm %s893_s1, %s506_s22 }
  0x20   : > { %s155_s17 = scalar_lea.vmem [#allocation9], %s505_s23  ;;  %s152_s24 = scalar_lea.sflag [#allocation10], %s751_s21 }
  0x21   : > { %s165_s18 = sshll.u32 %s155_s17, 4  ;;  %s686_s26 = smov [#allocation9]   ;;  %s166_s18 = int_to_ptr.vmem [resolvable:$true] %s165_s18 }
  0x22   : > { %s614_s25 = scalar_lea.vmem %s166_s18, 1536  ;;  %s619_s28 = sshll.u32 %s686_s26, 4  ;;  %s620_s28 = int_to_ptr.vmem [resolvable:$false] %s619_s28 }
  0x23   : > { %p615_p8 = scmp.ne.s32.totalorder %s166_s18, %s614_s25  ;;  %s621_s29 = scalar_lea.vmem %s620_s28, 3072 }
  0x24   : > { %p622_p10 = scmp.lt.s32.totalorder %s166_s18, %s620_s28  ;;  %p623_p11 = scmp.lt.s32.totalorder %s621_s29, %s614_s25 }
  0x25   : > { %p617_p13 = pnand %p615_p8, %p575_p12 }
  0x26   : > { %p624_p1 = por %p623_p11, %p622_p10 }
  0x27   : > { %p618_p0 = pneg %p617_p13 }
  0x29   : > { %p625_p2 = pnand %p624_p1, %p618_p0 }
  0x2b   : > { %628 = shalt.err (!%p625_p2)
}
  0x2c   : > { %520 = dma.hbm_to_vmem [thread:$0]  (!%p758_p9), %s163_s15, 1536, %s166_s18, %s152_s24  }
  0x2d   : > { %174 = sbr.rel (%p776_p6) target bundleno = 255 (0xff), region = 28  ;;  %s176_s21 = sand.u32 (!%p776_p6), 1, %s667_s10  }
  0x2e   : > { %s509_s22 = smul.u32 (!%p776_p6), 96, %s176_s21  ;;  %s177_s23 = scalar_lea.sflag (!%p776_p6), [#allocation8], %s176_s21 }
  0x30   : > { %s792_s30 = scalar_lea.vmem (!%p776_p6), [#allocation7], %s509_s22 }
  0x32   : > { %654 = dma.done.wait (%p742_p7), %s177_s23, 1536  }
  0x33   : > { %656 = vsyncadd (%p742_p7), %s177_s23, 4294965760  ;;  %s186_s3 = scalar_lea.sflag [#allocation10], %s176_s21  ;;  %s798_s4 = scalar_lea.vmem [#allocation9], %s509_s22 }
  0x34   : > { %658 = dma.done.wait (%p742_p7), %s186_s3, 1536  }
  0x35   : > { %660 = vsyncadd (%p742_p7), %s186_s3, 4294965760  ;;  %vm224_vm0 = vcmask 7168   ;;  %v687_v0 = vmov 0.0   ;;  %v230_v1 = vld [vmem:[%s792_s30] sm:$0xff]  ;;  %v231_v2 = vld [vmem:[%s792_s30 + $0x8] sm:$0xff]  ;;  %p216_p7 = scmp.lt.s32.totalorder %s675_s12, 1 }
  0x36   : > { %225 = vst.msk [vmem:[#allocation2] sm:$0xff] %vm224_vm0, %v687_v0  ;;  %226 = vst.msk [vmem:[#allocation3] sm:$0xff] %vm224_vm0, %v687_v0  ;;  %v232_v3 = vld [vmem:[%s792_s30 + $0x10] sm:$0xff]  ;;  %v255_v4 = vadd.f32 %v231_v2, %v230_v1  ;;  %v288_v5 = vmul.f32 %v230_v1, %v230_v1  ;;  %v289_v6 = vmul.f32 %v231_v2, %v231_v2  ;;  %v233_v7 = vld [vmem:[%s792_s30 + $0x18] sm:$0xff] }
  0x37   : > { %227 = vst.msk [vmem:[#allocation4] sm:$0xff] %vm224_vm0, %v687_v0  ;;  %228 = vst.msk [vmem:[#allocation5] sm:$0xff] %vm224_vm0, %v687_v0  ;;  %v290_v8 = vmul.f32 %v232_v3, %v232_v3  ;;  %v814_v9 = vld [vmem:[%s792_s30 + $0x20] sm:$0xff]  ;;  %v291_v11 = vmul.f32 %v233_v7, %v233_v7  ;;  %v243_v14 = vld [vmem:[%s798_s4 + $0x8] sm:$0xff]  ;;  %s906_s12 = smov (!%p216_p7, %s675_s12), 1 }
  0x38   : > { %229 = vst.msk [vmem:[#allocation6] sm:$0xff] %vm224_vm0, %v687_v0  ;;  %v256_v10 = vadd.f32 %v255_v4, %v232_v3  ;;  %v300_v12 = vadd.f32 %v289_v6, %v288_v5  ;;  %v242_v13 = vld [vmem:[%s798_s4] sm:$0xff]  ;;  %v244_v15 = vld [vmem:[%s798_s4 + $0x10] sm:$0xff]  ;;  %v820_v18 = vld [vmem:[%s792_s30 + $0x28] sm:$0xff]  ;;  %v292_v19 = vmul.f32 %v814_v9, %v814_v9  ;;  %v317_v23 = vmul.f32 %v243_v14, %v243_v14  ;;  %s502_s19 = sshll.u32 %s906_s12, 3 }
  0x39   : > { %v272_v17 = vadd.f32 %v243_v14, %v242_v13  ;;  %v245_v21 = vld [vmem:[%s798_s4 + $0x18] sm:$0xff]  ;;  %v316_v22 = vmul.f32 %v242_v13, %v242_v13  ;;  %v827_v26 = vld [vmem:[%s792_s30 + $0x30] sm:$0xff]  ;;  %v293_v27 = vmul.f32 %v820_v18, %v820_v18  ;;  %v246_v29 = vld [vmem:[%s798_s4 + $0x20] sm:$0xff]  ;;  %v318_v30 = vmul.f32 %v244_v15, %v244_v15  ;;  %s219_s6 = scalar_lea.vmem %s894_s2, %s502_s19 }
  0x3a   : > { %v257_v16 = vadd.f32 %v256_v10, %v233_v7  ;;  %v301_v20 = vadd.f32 %v300_v12, %v290_v8  ;;  %v834_v33 = vld [vmem:[%s792_s30 + $0x38] sm:$0xff]  ;;  %v294_v34 = vmul.f32 %v827_v26, %v827_v26  ;;  %v247_v36 = vld [vmem:[%s798_s4 + $0x28] sm:$0xff]  ;;  %v319_v37 = vmul.f32 %v245_v21, %v245_v21  ;;  %v843_v43 = vld [vmem:[%s792_s30 + $0x40] sm:$0xff] }
  0x3b   : > { %v273_v25 = vadd.f32 %v272_v17, %v244_v15  ;;  %v328_v38 = vadd.f32 %v317_v23, %v316_v22  ;;  %v295_v40 = vmul.f32 %v834_v33, %v834_v33  ;;  %v320_v42 = vmul.f32 %v246_v29, %v246_v29  ;;  %v248_v45 = vld [vmem:[%s798_s4 + $0x30] sm:$0xff]  ;;  %v239_v52 = vld [vmem:[%s792_s30 + $0x48] sm:$0xff]  ;;  %v249_v54 = vld [vmem:[%s798_s4 + $0x38] sm:$0xff] }
  0x3c   : > { %v258_v24 = vadd.f32 %v257_v16, %v814_v9  ;;  %v302_v28 = vadd.f32 %v301_v20, %v291_v11  ;;  %v344_v47 = vmul.f32 %v242_v13, %v230_v1  ;;  %v345_v48 = vmul.f32 %v243_v14, %v231_v2  ;;  %v240_v62 = vld [vmem:[%s792_s30 + $0x50] sm:$0xff]  ;;  %v250_v0 = vld [vmem:[%s798_s4 + $0x40] sm:$0xff]  ;;  %v241_v11 = vld [vmem:[%s792_s30 + $0x58] sm:$0xff] }
  0x3d   : > { %v274_v32 = vadd.f32 %v273_v25, %v245_v21  ;;  %v329_v46 = vadd.f32 %v328_v38, %v318_v30  ;;  %v296_v50 = vmul.f32 %v843_v43, %v843_v43  ;;  %v321_v55 = vmul.f32 %v247_v36, %v247_v36 }
  0x3e   : > { %v259_v31 = vadd.f32 %v258_v24, %v820_v18  ;;  %v303_v35 = vadd.f32 %v302_v28, %v292_v19  ;;  %v346_v57 = vmul.f32 %v244_v15, %v232_v3  ;;  %v297_v59 = vmul.f32 %v239_v52, %v239_v52  ;;  %v251_v3 = vld [vmem:[%s798_s4 + $0x48] sm:$0xff] }
  0x3f   : > { %v275_v41 = vadd.f32 %v274_v32, %v246_v29  ;;  %v330_v56 = vadd.f32 %v329_v46, %v319_v37  ;;  %v322_v61 = vmul.f32 %v248_v45, %v248_v45  ;;  %v347_v2 = vmul.f32 %v245_v21, %v233_v7  ;;  %v252_v7 = vld [vmem:[%s798_s4 + $0x50] sm:$0xff] }
  0x40   : > { %v260_v39 = vadd.f32 %v259_v31, %v827_v26  ;;  %v304_v44 = vadd.f32 %v303_v35, %v293_v27  ;;  %v356_v4 = vadd.f32 %v345_v48, %v344_v47  ;;  %v298_v6 = vmul.f32 %v240_v62, %v240_v62  ;;  %v253_v31 = vld [vmem:[%s798_s4 + $0x58] sm:$0xff] }
  0x41   : > { %v276_v51 = vadd.f32 %v275_v41, %v247_v36  ;;  %v331_v1 = vadd.f32 %v330_v56, %v320_v42  ;;  %v323_v10 = vmul.f32 %v249_v54, %v249_v54  ;;  %v348_v14 = vmul.f32 %v246_v29, %v814_v9 }
  0x42   : > { %v261_v49 = vadd.f32 %v260_v39, %v834_v33  ;;  %v305_v53 = vadd.f32 %v304_v44, %v294_v34  ;;  %v357_v15 = vadd.f32 %v356_v4, %v346_v57  ;;  %v299_v17 = vmul.f32 %v241_v11, %v241_v11  ;;  %v287_v57 = vld [vmem:[#allocation4] sm:$0xff] }
  0x43   : > { %v277_v60 = vadd.f32 %v276_v51, %v248_v45  ;;  %v332_v13 = vadd.f32 %v331_v1, %v321_v55  ;;  %v324_v20 = vmul.f32 %v250_v0, %v250_v0  ;;  %v349_v23 = vmul.f32 %v247_v36, %v820_v18 }
  0x44   : > { %v262_v58 = vadd.f32 %v261_v49, %v843_v43  ;;  %v306_v63 = vadd.f32 %v305_v53, %v295_v40  ;;  %v358_v24 = vadd.f32 %v357_v15, %v347_v2  ;;  %v325_v28 = vmul.f32 %v251_v3, %v251_v3  ;;  %v343_v2 = vld [vmem:[#allocation6] sm:$0xff] }
  0x45   : > { %v278_v8 = vadd.f32 %v277_v60, %v249_v54  ;;  %v333_v21 = vadd.f32 %v332_v13, %v322_v61  ;;  %v350_v34 = vmul.f32 %v248_v45, %v827_v26  ;;  %v326_v35 = vmul.f32 %v252_v7, %v252_v7  ;;  %v315_v61 = vld [vmem:[#allocation5] sm:$0xff] }
  0x46   : > { %v263_v5 = vadd.f32 %v262_v58, %v239_v52  ;;  %v307_v12 = vadd.f32 %v306_v63, %v296_v50  ;;  %v359_v9 = vadd.f32 %v358_v24, %v348_v14  ;;  %v351_v39 = vmul.f32 %v249_v54, %v834_v33  ;;  %v254_v54 = vld [vmem:[#allocation2] sm:$0xff]  ;;  %v271_v58 = vld [vmem:[#allocation3] sm:$0xff] }
  0x47   : > { %v279_v19 = vadd.f32 %v278_v8, %v250_v0  ;;  %v334_v32 = vadd.f32 %v333_v21, %v323_v10  ;;  %v327_v18 = vmul.f32 %v253_v31, %v253_v31  ;;  %v352_v42 = vmul.f32 %v250_v0, %v843_v43 }
  0x48   : > { %v264_v16 = vadd.f32 %v263_v5, %v240_v62  ;;  %v308_v22 = vadd.f32 %v307_v12, %v297_v59  ;;  %v360_v40 = vadd.f32 %v359_v9, %v349_v23  ;;  %v353_v47 = vmul.f32 %v251_v3, %v239_v52 }
  0x49   : > { %v280_v27 = vadd.f32 %v279_v19, %v251_v3  ;;  %v335_v38 = vadd.f32 %v334_v32, %v324_v20  ;;  %v354_v48 = vmul.f32 %v252_v7, %v240_v62  ;;  %v355_v50 = vmul.f32 %v253_v31, %v241_v11 }
  0x4a   : > { %v265_v25 = vadd.f32 %v264_v16, %v241_v11  ;;  %v309_v30 = vadd.f32 %v308_v22, %v298_v6  ;;  %v361_v44 = vadd.f32 %v360_v40, %v350_v34 }
  0x4b   : > { %v281_v29 = vadd.f32 %v280_v27, %v252_v7  ;;  %v336_v36 = vadd.f32 %v335_v38, %v325_v28 }
  0x4c   : > { %266 = vadd.xlane.f32.xlu0 %v265_v25  ;;  %v310_v37 = vadd.f32 %v309_v30, %v299_v17  ;;  %v362_v26 = vadd.f32 %v361_v44, %v351_v39 }
  0x4d   : > { %v282_v41 = vadd.f32 %v281_v29, %v253_v31  ;;  %v337_v46 = vadd.f32 %v336_v36, %v326_v35 }
  0x4e   : > { %311 = vadd.xlane.f32.xlu1 %v310_v37  ;;  %v363_v49 = vadd.f32 %v362_v26, %v352_v42 }
  0x4f   : > { %v338_v45 = vadd.f32 %v337_v46, %v327_v18 }
  0x50   : > { %283 = vadd.xlane.f32.xlu0 %v282_v41  ;;  %v364_v51 = vadd.f32 %v363_v49, %v353_v47 }
  0x52   : > { %339 = vadd.xlane.f32.xlu1 %v338_v45  ;;  %v365_v53 = vadd.f32 %v364_v51, %v354_v48 }
  0x54   : > { %v366_v33 = vadd.f32 %v365_v53, %v355_v50 }
  0x56   : > { %367 = vadd.xlane.f32.xlu0 %v366_v33 }
  0xd5   : > { %v267_v55 = vpop.xlane.xlu0 %266 }
  0xd6   : > { %v268_v56 = vadd.f32 %v267_v55, %v254_v54 }
  0xd7   : > { %v312_v43 = vpop.xlane.xlu1 %311 }
  0xd8   : > { %270 = vst.msk [vmem:[#allocation2] sm:$0xff] %vm224_vm0, %v268_v56  ;;  %v313_v59 = vadd.f32 %v312_v43, %v287_v57 }
  0xd9   : > { %v284_v52 = vpop.xlane.xlu0 %283 }
  0xda   : > { %v285_v60 = vadd.f32 %v284_v52, %v271_v58  ;;  %314 = vst.msk [vmem:[#allocation4] sm:$0xff] %vm224_vm0, %v313_v59 }
  0xdb   : > { %v340_v62 = vpop.xlane.xlu1 %339 }
  0xdc   : > { %286 = vst.msk [vmem:[#allocation3] sm:$0xff] %vm224_vm0, %v285_v60  ;;  %v341_v0 = vadd.f32 %v340_v62, %v315_v61 }
  0xde   : > { %342 = vst.msk [vmem:[#allocation5] sm:$0xff] %vm224_vm0, %v341_v0 }
  0xdf   : > { %v374_v63 = vld [vmem:[#allocation2] sm:$0xff]  ;;  %v368_v6 = vpop.xlane.xlu0 %367 }
  0xe0   : > { %v381_v1 = vmul.f32 %v374_v63, %v374_v63  ;;  %v369_v10 = vadd.f32 %v368_v6, %v343_v2 }
  0xe1   : > { %v380_v11 = vld [vmem:[#allocation4] sm:$0xff] }
  0xe2   : > { %v382_v8 = vmul.f32 0.0006510417, %v381_v1  ;;  %370 = vst.msk [vmem:[#allocation6] sm:$0xff] %vm224_vm0, %v369_v10 }
  0xe3   : > { %v375_v4 = vld [vmem:[#allocation3] sm:$0xff] }
  0xe4   : > { %v385_v5 = vmul.f32 %v375_v4, %v375_v4  ;;  %v383_v13 = vsub.f32 %v380_v11, %v382_v8  ;;  %v377_v16 = vmul.f32 %v375_v4, %v374_v63 }
  0xe5   : > { %v384_v3 = vld [vmem:[#allocation5] sm:$0xff] }
  0xe6   : > { %v386_v12 = vmul.f32 0.0006510417, %v385_v5  ;;  %v378_v17 = vmul.f32 0.0006510417, %v377_v16 }
  0xe8   : > { %v387_v14 = vsub.f32 %v384_v3, %v386_v12 }
  0xe9   : > { %v376_v19 = vld [vmem:[#allocation6] sm:$0xff] }
  0xea   : > { %v388_v15 = vmul.f32 %v387_v14, %v383_v13  ;;  %v379_v20 = vsub.f32 %v376_v19, %v378_v17 }
  0xec   : > { %571 = vrsqrt.f32 %v388_v15 }
  0xf9   : > { %v572_v22 = vpop.eup %571 }
  0xfa   : > { %v390_v7 = vmul.f32 %v572_v22, %v379_v20 }
  0xfc   : > { %v391_v21 = vsub.f32 1.0, %v390_v7 }
  0xfe   : > { %392 = vst.msk [vmem:[%s219_s6] sm:$0xff] %vm224_vm0, %v391_v21 }
  0xff PF: > { %s18_s14 = sadd.s32 1, %s683_s14   ;;  %s898_s9 = smov %s667_s10 }
 0x100   : > { %p15_p9 = scmp.ge.s32.totalorder %s18_s14, 4   ;;  %s899_s10 = smov %s671_s11 }
 0x101   : > { %s900_s11 = smov %s748_s20  ;;  %s901_s12 = smov %s679_s13 }
 0x102   : > { %s902_s13 = smov %s904_s16  ;;  %17 = sbr.rel (!%p15_p9) target bundleno = 6 (0x6), region = 89 }
 0x107   :  { %412 = vsyncpa [#allocation8], 1 }
 0x108   :  { %414 = vsyncpa [#allocation8 + $0x1], 1 }
 0x109   :  { %415 = vsyncpa [#allocation10], 1 }
 0x10a   :  { %417 = vsyncpa [#allocation10 + $0x1], 1 }

</bundles_post_ra>
